<compile_context>
chip_gen: v5e
topology: v5e:2x2
jax: 0.10.0
libtpu: 0.0.40
codegen_flags: <defaults>
</compile_context>

<pallas_src>
import functools

import jax
import jax.numpy as jnp
from jax.experimental import pallas as pl
from jax.experimental.pallas import tpu as pltpu


def residual_layer_kernel(x_ref, w1_ref, b1_ref, w2_ref, b2_ref, o_ref):
    x = x_ref[...]                                  # native dtype -> full MXU rate
    # lin1 + ReLU (f32 accumulation on the MXU)
    h = jnp.dot(x, w1_ref[...], preferred_element_type=jnp.float32)
    h = jnp.maximum(h + b1_ref[...].astype(jnp.float32), 0.0)
    # lin2 + ReLU (feed the MXU in the weight dtype again)
    h = h.astype(w2_ref.dtype)
    h2 = jnp.dot(h, w2_ref[...], preferred_element_type=jnp.float32)
    h2 = jnp.maximum(h2 + b2_ref[...].astype(jnp.float32), 0.0)
    # residual add in f32, single cast on the way out
    o_ref[...] = (h2 + x.astype(jnp.float32)).astype(o_ref.dtype)


def _pick_tm(m: int, max_tm: int = 512) -> int:
    """Whole M when it fits in one tile, otherwise 512-row tiles.

    512 is a multiple of 8 (sublane tiling), large enough to amortize the
    ~0.35us per-grid-step overhead, and small enough that the f32
    intermediates stay comfortably inside VMEM. Partial trailing tiles are
    masked by Pallas, so M need not be a multiple of tm.
    """
    return m if m <= max_tm else max_tm


@functools.partial(jax.jit, static_argnames=("tm",))
def _residual_layer_2d(x, w1, b1, w2, b2, *, tm):
    M, D = x.shape
    grid = (pl.cdiv(M, tm),)

    elt = x.dtype.itemsize
    # x / out tiles are double-buffered by the pipeline; weights and biases
    # are resident (budgeted double-buffered to be conservative); plus f32
    # intermediate headroom inside the kernel body.
    vmem_bytes = (
        2 * tm * D * elt            # x tiles
        + 2 * tm * D * elt          # out tiles
        + 2 * 2 * D * D * elt       # W1, W2
        + 2 * 2 * 1 * D * elt       # b1, b2
        + 4 * tm * D * 4            # f32 intermediates / headroom
    )
    vmem_limit = max(vmem_bytes + (4 << 20), 32 << 20)
    vmem_limit = min(vmem_limit, 64 << 20)  # stay inside v7x's 64 MiB VMEM

    return pl.pallas_call(
        residual_layer_kernel,
        out_shape=jax.ShapeDtypeStruct((M, D), x.dtype),
        grid_spec=pltpu.PrefetchScalarGridSpec(
            num_scalar_prefetch=0,
            grid=grid,
            in_specs=[
                pl.BlockSpec((tm, D), lambda i: (i, 0)),  # x tile
                pl.BlockSpec((D, D), lambda i: (0, 0)),   # W1 (VMEM-resident)
                pl.BlockSpec((1, D), lambda i: (0, 0)),   # b1 (VMEM-resident)
                pl.BlockSpec((D, D), lambda i: (0, 0)),   # W2 (VMEM-resident)
                pl.BlockSpec((1, D), lambda i: (0, 0)),   # b2 (VMEM-resident)
            ],
            out_specs=pl.BlockSpec((tm, D), lambda i: (i, 0)),
        ),
        compiler_params=pltpu.CompilerParams(
            dimension_semantics=("parallel",),
            vmem_limit_bytes=int(vmem_limit),
        ),
    )(x, w1, b1, w2, b2)


def residual_layer(x, w1, b1, w2, b2, *, tm=None):
    """ResidualLayer forward.

    x: [..., D] (arbitrary leading dims, like the PyTorch module)
    w1, w2: [D, D] stored as [in_dim, out_dim] (i.e. PyTorch weight.T)
    b1, b2: [1, D]
    """
    orig_shape = x.shape
    D = orig_shape[-1]
    x2 = x.reshape(-1, D)
    M = x2.shape[0]
    if tm is None:
        tm = _pick_tm(M)
    out = _residual_layer_2d(x2, w1, b1, w2, b2, tm=tm)
    return out.reshape(orig_shape)


def reference(x, w1, b1, w2, b2):
    h = jnp.maximum(x @ w1 + b1, 0.0)
    h2 = jnp.maximum(h @ w2 + b2, 0.0)
    return h2 + x


def _make_inputs(key, batch_shape, D, dtype=jnp.float32):
    kx, k1, k2, k3, k4 = jax.random.split(key, 5)
    x = jax.random.normal(kx, (*batch_shape, D), dtype=jnp.float32).astype(dtype)
    # nn.Linear-style init: weight [out, in], stored here transposed as [in, out].
    limit = (6.0 / (D + D)) ** 0.5
    w1 = jax.random.uniform(k1, (D, D), minval=-limit, maxval=limit).astype(dtype)
    w2 = jax.random.uniform(k2, (D, D), minval=-limit, maxval=limit).astype(dtype)
    b_limit = 1.0 / (D ** 0.5)
    b1 = jax.random.uniform(k3, (1, D), minval=-b_limit, maxval=b_limit).astype(dtype)
    b2 = jax.random.uniform(k4, (1, D), minval=-b_limit, maxval=b_limit).astype(dtype)
    return x, w1, b1, w2, b2


if __name__ == "__main__":
    key = jax.random.PRNGKey(0)
    k_small, k_big = jax.random.split(key)

    # 1) Module-default feature size (in_dim = out_dim = 100) with leading
    #    batch dims, as the PyTorch module is used: x [2, 8, 100].
    #    Whole problem is a single grid step (tm = M = 16); blocks use
    #    full-array dims so the unaligned D=100 is handled by Mosaic padding.
    x, w1, b1, w2, b2 = _make_inputs(k_small, (2, 8), 100)
    out = jax.block_until_ready(residual_layer(x, w1, b1, w2, b2))
    ref = reference(x.reshape(-1, 100), w1, b1, w2, b2).reshape(x.shape)
    assert out.shape == x.shape
    assert jnp.allclose(out, ref, atol=1e-4, rtol=1e-4), "mismatch (D=100)"

    # 2) Larger, lane-aligned case exercising the tiled grid (tm = 256 here
    #    would be a single step, so use M = 1024 -> 2 parallel grid steps,
    #    shardable across both v7x TensorCores).
    x, w1, b1, w2, b2 = _make_inputs(k_big, (1024,), 128)
    out = jax.block_until_ready(residual_layer(x, w1, b1, w2, b2))
    ref = reference(x, w1, b1, w2, b2)
    assert out.shape == x.shape
    assert jnp.allclose(out, ref, atol=1e-4, rtol=1e-4), "mismatch (M=1024, D=128)"

    print("KERNEL_OK")
</pallas_src>

<mosaic_0001>
module attributes {stable_mosaic.version = 11 : i64} {
  func.func @residual_layer_kernel(%arg0: i32, %arg1: memref<16x100xf32, #tpu.memory_space<vmem>>, %arg2: memref<100x100xf32, #tpu.memory_space<vmem>>, %arg3: memref<1x100xf32, #tpu.memory_space<vmem>>, %arg4: memref<100x100xf32, #tpu.memory_space<vmem>>, %arg5: memref<1x100xf32, #tpu.memory_space<vmem>>, %arg6: memref<16x100xf32, #tpu.memory_space<vmem>>) attributes {dimension_semantics = [#tpu.dimension_semantics<parallel>], iteration_bounds = array<i64: 1>, scalar_prefetch = 0 : i64, scratch_operands = 0 : i64, tpu.core_type = #tpu.core_type<tc>, window_params = [{transform_indices = @transform_0, window_bounds = array<i64: 16, 100>}, {pipeline_mode = #tpu.pipeline_mode<synchronous>, transform_indices = @transform_1, window_bounds = array<i64: 100, 100>}, {pipeline_mode = #tpu.pipeline_mode<synchronous>, transform_indices = @transform_2, window_bounds = array<i64: 1, 100>}, {pipeline_mode = #tpu.pipeline_mode<synchronous>, transform_indices = @transform_3, window_bounds = array<i64: 100, 100>}, {pipeline_mode = #tpu.pipeline_mode<synchronous>, transform_indices = @transform_4, window_bounds = array<i64: 1, 100>}, {transform_indices = @transform_5, window_bounds = array<i64: 16, 100>}]} {
    %c0 = arith.constant 0 : index
    %c0_0 = arith.constant 0 : index
    %0 = vector.load %arg1[%c0, %c0_0] : memref<16x100xf32, #tpu.memory_space<vmem>>, vector<16x100xf32>
    %c0_1 = arith.constant 0 : index
    %c0_2 = arith.constant 0 : index
    %1 = vector.load %arg2[%c0_1, %c0_2] : memref<100x100xf32, #tpu.memory_space<vmem>>, vector<100x100xf32>
    %cst = arith.constant dense<0.000000e+00> : vector<16x100xf32>
    %2 = tpu.matmul %0, %1, %cst {dimension_numbers = #tpu.dot_dimension_numbers<[1], [0], [0], [1], [0, 0, 1, 1], [], []>} : vector<16x100xf32>, vector<100x100xf32>, vector<16x100xf32> -> vector<16x100xf32>
    %c0_3 = arith.constant 0 : index
    %c0_4 = arith.constant 0 : index
    %3 = vector.load %arg3[%c0_3, %c0_4] : memref<1x100xf32, #tpu.memory_space<vmem>>, vector<1x100xf32>
    %4 = vector.broadcast %3 : vector<1x100xf32> to vector<16x100xf32>
    %5 = arith.addf %2, %4 : vector<16x100xf32>
    %cst_5 = arith.constant 0.000000e+00 : f32
    %6 = vector.broadcast %cst_5 : f32 to vector<16x100xf32>
    %7 = arith.maximumf %5, %6 : vector<16x100xf32>
    %c0_6 = arith.constant 0 : index
    %c0_7 = arith.constant 0 : index
    %8 = vector.load %arg4[%c0_6, %c0_7] : memref<100x100xf32, #tpu.memory_space<vmem>>, vector<100x100xf32>
    %cst_8 = arith.constant dense<0.000000e+00> : vector<16x100xf32>
    %9 = tpu.matmul %7, %8, %cst_8 {dimension_numbers = #tpu.dot_dimension_numbers<[1], [0], [0], [1], [0, 0, 1, 1], [], []>} : vector<16x100xf32>, vector<100x100xf32>, vector<16x100xf32> -> vector<16x100xf32>
    %c0_9 = arith.constant 0 : index
    %c0_10 = arith.constant 0 : index
    %10 = vector.load %arg5[%c0_9, %c0_10] : memref<1x100xf32, #tpu.memory_space<vmem>>, vector<1x100xf32>
    %11 = vector.broadcast %10 : vector<1x100xf32> to vector<16x100xf32>
    %12 = arith.addf %9, %11 : vector<16x100xf32>
    %cst_11 = arith.constant 0.000000e+00 : f32
    %13 = vector.broadcast %cst_11 : f32 to vector<16x100xf32>
    %14 = arith.maximumf %12, %13 : vector<16x100xf32>
    %15 = arith.addf %14, %0 : vector<16x100xf32>
    %c0_12 = arith.constant 0 : index
    %c0_13 = arith.constant 0 : index
    %16 = vector.load %arg6[%c0_12, %c0_13] : memref<16x100xf32, #tpu.memory_space<vmem>>, vector<16x100xf32>
    tpu.vector_store %arg6[%c0_12, %c0_13], %15 {strides = array<i32>} : memref<16x100xf32, #tpu.memory_space<vmem>>, vector<16x100xf32>,
    return
  }
  func.func @transform_0(%arg0: i32) -> (i32, i32) {
    %c0_i32 = arith.constant 0 : i32
    %c0_i32_0 = arith.constant 0 : i32
    return %arg0, %c0_i32 : i32, i32
  }
  func.func @transform_1(%arg0: i32) -> (i32, i32) {
    %c0_i32 = arith.constant 0 : i32
    %c0_i32_0 = arith.constant 0 : i32
    %c0_i32_1 = arith.constant 0 : i32
    return %c0_i32, %c0_i32_0 : i32, i32
  }
  func.func @transform_2(%arg0: i32) -> (i32, i32) {
    %c0_i32 = arith.constant 0 : i32
    %c0_i32_0 = arith.constant 0 : i32
    %c0_i32_1 = arith.constant 0 : i32
    return %c0_i32, %c0_i32_0 : i32, i32
  }
  func.func @transform_3(%arg0: i32) -> (i32, i32) {
    %c0_i32 = arith.constant 0 : i32
    %c0_i32_0 = arith.constant 0 : i32
    %c0_i32_1 = arith.constant 0 : i32
    return %c0_i32, %c0_i32_0 : i32, i32
  }
  func.func @transform_4(%arg0: i32) -> (i32, i32) {
    %c0_i32 = arith.constant 0 : i32
    %c0_i32_0 = arith.constant 0 : i32
    %c0_i32_1 = arith.constant 0 : i32
    return %c0_i32, %c0_i32_0 : i32, i32
  }
  func.func @transform_5(%arg0: i32) -> (i32, i32) {
    %c0_i32 = arith.constant 0 : i32
    %c0_i32_0 = arith.constant 0 : i32
    return %arg0, %c0_i32 : i32, i32
  }
}

</mosaic_0001>

<bundles_post_ra>
// kernel: _residual_layer_2d.1
= control target key start
LH: loop header
LB: loop body
LE: loop exit
PB: predicated region body
PF: predicated region fallthrough
CT: control target
= control target key end

     0   :  { %10 = vsyncpa [#allocation3], 0  ;;  %s412_s0 = inlined_call_operand.hbm [shape: f32[16,100], index: 0, kind: input, shape index: {}]   ;;  %s413_s1 = inlined_call_operand.hbm [shape: f32[100,100], index: 1, kind: input, shape index: {}]   ;;  %s414_s2 = inlined_call_operand.vmem [shape: f32[1,100], index: 2, kind: input, shape index: {}]   ;;  %s415_s3 = inlined_call_operand.hbm [shape: f32[100,100], index: 3, kind: input, shape index: {}]   ;;  %s416_s4 = inlined_call_operand.vmem [shape: f32[1,100], index: 4, kind: input, shape index: {}]   ;;  %s417_s5 = inlined_call_operand.hbm [shape: f32[16,100], index: 5, kind: output, shape index: {}]  }
   0x1   :  { %11 = vsyncpa [#allocation6], 0 }
   0x2   :  { %12 = vsyncpa [#allocation4], 0  ;;  %s30_s20 = sshll.u32 %s413_s1, 4  ;;  %s340_s21 = smov [#allocation5]   ;;  %s31_s20 = int_to_ptr.hbm [resolvable:$true] %s30_s20 }
   0x3   :  { %s32_s22 = sshll.u32 %s340_s21, 4  ;;  %s17_s25 = sshll.u32 %s412_s0, 4  ;;  %s33_s22 = int_to_ptr.vmem [resolvable:$true] %s32_s22  ;;  %s18_s25 = int_to_ptr.hbm [resolvable:$true] %s17_s25 }
   0x4   :  { %s341_s26 = smov 128   ;;  %s342_s27 = smov 8  }
   0x5   :  { %38 = dma.hbm_to_vmem [thread:$0]  %s31_s20, 1664, %s33_s22, [#allocation6], %s341_s26, %s341_s26, %s342_s27  }
   0x6   :  { %s343_s28 = smov [#allocation2]   ;;  %s45_s1 = sshll.u32 %s415_s3, 4  ;;  %s46_s1 = int_to_ptr.hbm [resolvable:$true] %s45_s1 }
   0x7   :  { %s19_s29 = sshll.u32 %s343_s28, 4  ;;  %s344_s0 = smov [#allocation7]   ;;  %s20_s29 = int_to_ptr.vmem [resolvable:$true] %s19_s29 }
   0x8   :  { %25 = dma.hbm_to_vmem [thread:$0]  %s18_s25, 256, %s20_s29, [#allocation3], %s341_s26, %s341_s26, %s342_s27  }
   0x9   :  { %s47_s7 = sshll.u32 %s344_s0, 4  ;;  %s48_s7 = int_to_ptr.vmem [resolvable:$true] %s47_s7 }
   0xa   :  { %53 = dma.hbm_to_vmem [thread:$0]  %s46_s1, 1664, %s48_s7, [#allocation6], %s341_s26, %s341_s26, %s342_s27  }
   0xb   :  { %334 = dma.done.wait [#allocation3], 256  }
   0xc   :  { %335 = vsyncadd [#allocation3], 4294967040 }
   0xd   :  { %336 = dma.done.wait [#allocation6], 3328  }
   0xe   :  { %337 = vsyncadd [#allocation6], 4294963968  ;;  %vm94_vm0 = vcmask 1043456   ;;  %v82_v0 = vld [vmem:[#allocation5 + $0x60] sm:$0xf]  ;;  %v81_v1 = vld [vmem:[#allocation5 + $0x58] sm:$0xff] }
   0xf   :  { %204 = vmatpush.msk.msra.mxu2 %vm94_vm0, %v82_v0  ;;  %198 = vmatpush.msk.msra.mxu0 %vm94_vm0, %v82_v0  ;;  %v80_v2 = vld [vmem:[#allocation5 + $0x50] sm:$0xff]  ;;  %v79_v3 = vld [vmem:[#allocation5 + $0x48] sm:$0xff]  ;;  %v134_v5 = vld [vmem:[#allocation7 + $0x58] sm:$0xff]  ;;  %vm87_vm1 = vcmask 818176   ;;  %s184_s14 = sshll.u32 %s417_s5, 4  ;;  %s185_s14 = int_to_ptr.hbm [resolvable:$true] %s184_s14 }
  0x10   :  { %v135_v4 = vld [vmem:[#allocation7 + $0x60] sm:$0xf]  ;;  %v78_v6 = vld [vmem:[#allocation5 + $0x40] sm:$0xff]  ;;  %v133_v7 = vld [vmem:[#allocation7 + $0x50] sm:$0xff] }
  0x11   :  { %205 = vmatpush.msra.mxu2 %v81_v1  ;;  %102 = vmatpush.msra.mxu0 %v81_v1  ;;  %v77_v8 = vld [vmem:[#allocation5 + $0x38] sm:$0xff]  ;;  %v132_v9 = vld [vmem:[#allocation7 + $0x48] sm:$0xff]  ;;  %v131_v11 = vld [vmem:[#allocation7 + $0x40] sm:$0xff] }
  0x12   :  { %217 = vmatpush.msk.msra.mxu3 %vm94_vm0, %v135_v4  ;;  %201 = vmatpush.msk.msra.mxu1 %vm94_vm0, %v135_v4  ;;  %v76_v10 = vld [vmem:[#allocation5 + $0x30] sm:$0xff]  ;;  %v75_v12 = vld [vmem:[#allocation5 + $0x28] sm:$0xff]  ;;  %v130_v13 = vld [vmem:[#allocation7 + $0x38] sm:$0xff] }
  0x13   :  { %206 = vmatpush.msra.mxu2 %v80_v2  ;;  %103 = vmatpush.msra.mxu0 %v80_v2  ;;  %v74_v14 = vld [vmem:[#allocation5 + $0x20] sm:$0xff]  ;;  %v129_v15 = vld [vmem:[#allocation7 + $0x30] sm:$0xff]  ;;  %v128_v17 = vld [vmem:[#allocation7 + $0x28] sm:$0xff] }
  0x14   :  { %218 = vmatpush.msra.mxu3 %v134_v5  ;;  %153 = vmatpush.msra.mxu1 %v134_v5  ;;  %v73_v16 = vld [vmem:[#allocation5 + $0x18] sm:$0xff]  ;;  %v72_v18 = vld [vmem:[#allocation5 + $0x10] sm:$0xff]  ;;  %v127_v19 = vld [vmem:[#allocation7 + $0x20] sm:$0xff] }
  0x15   :  { %207 = vmatpush.msra.mxu2 %v79_v3  ;;  %104 = vmatpush.msra.mxu0 %v79_v3  ;;  %v71_v20 = vld [vmem:[#allocation5 + $0x8] sm:$0xff]  ;;  %v126_v21 = vld [vmem:[#allocation7 + $0x18] sm:$0xff]  ;;  %v69_v23 = vld [vmem:[#allocation2 + $0x8] sm:$0xff] }
  0x16   :  { %219 = vmatpush.msra.mxu3 %v133_v7  ;;  %154 = vmatpush.msra.mxu1 %v133_v7  ;;  %v70_v22 = vld [vmem:[#allocation5] sm:$0xff]  ;;  %v68_v24 = vld [vmem:[#allocation2] sm:$0xff]  ;;  %v125_v25 = vld [vmem:[#allocation7 + $0x10] sm:$0xff] }
  0x17   :  { %208 = vmatpush.msra.mxu2 %v78_v6  ;;  %105 = vmatpush.msra.mxu0 %v78_v6  ;;  %v124_v26 = vld [vmem:[#allocation7 + $0x8] sm:$0xff]  ;;  %v123_v27 = vld [vmem:[#allocation7] sm:$0xff] }
  0x18   :  { %220 = vmatpush.msra.mxu3 %v132_v9  ;;  %155 = vmatpush.msra.mxu1 %v132_v9  ;;  %v236_v28 = vld [vmem:[%s414_s2] ss:$0 sm:$0xff]  ;;  %s345_s2 = smov [#allocation8]  }
  0x19   :  { %209 = vmatpush.msra.mxu2 %v77_v8  ;;  %106 = vmatpush.msra.mxu0 %v77_v8  ;;  %v237_v35 = vld [vmem:[%s416_s4] ss:$0 sm:$0xff]  ;;  %s182_s11 = sshll.u32 %s345_s2, 4  ;;  %s183_s11 = int_to_ptr.vmem [resolvable:$true] %s182_s11 }
  0x1a   :  { %221 = vmatpush.msra.mxu3 %v131_v11  ;;  %156 = vmatpush.msra.mxu1 %v131_v11 }
  0x1b   :  { %210 = vmatpush.msra.mxu2 %v76_v10  ;;  %107 = vmatpush.msra.mxu0 %v76_v10 }
  0x1c   :  { %222 = vmatpush.msra.mxu3 %v130_v13  ;;  %157 = vmatpush.msra.mxu1 %v130_v13 }
  0x1d   :  { %211 = vmatpush.msra.mxu2 %v75_v12  ;;  %108 = vmatpush.msra.mxu0 %v75_v12 }
  0x1e   :  { %223 = vmatpush.msra.mxu3 %v129_v15  ;;  %158 = vmatpush.msra.mxu1 %v129_v15 }
  0x1f   :  { %212 = vmatpush.msra.mxu2 %v74_v14  ;;  %109 = vmatpush.msra.mxu0 %v74_v14 }
  0x20   :  { %224 = vmatpush.msra.mxu3 %v128_v17  ;;  %159 = vmatpush.msra.mxu1 %v128_v17 }
  0x21   :  { %213 = vmatpush.msra.mxu2 %v73_v16  ;;  %110 = vmatpush.msra.mxu0 %v73_v16 }
  0x22   :  { %225 = vmatpush.msra.mxu3 %v127_v19  ;;  %160 = vmatpush.msra.mxu1 %v127_v19 }
  0x23   :  { %214 = vmatpush.msra.mxu2 %v72_v18  ;;  %111 = vmatpush.msra.mxu0 %v72_v18 }
  0x24   :  { %226 = vmatpush.msra.mxu3 %v126_v21  ;;  %161 = vmatpush.msra.mxu1 %v126_v21 }
  0x25   :  { %215 = vmatpush.msra.mxu2 %v71_v20  ;;  %112 = vmatpush.msra.mxu0 %v71_v20 }
  0x26   :  { %227 = vmatpush.msra.mxu3 %v125_v25  ;;  %162 = vmatpush.msra.mxu1 %v125_v25 }
  0x27   :  { %216 = vmatpush.msra.mxu2 %v70_v22  ;;  %113 = vmatpush.msra.mxu0 %v70_v22 }
  0x28   :  { %200 = vmatmul.msk.f32.vlgmr.msra.gmra.mxu2 %vm87_vm1, %v69_v23  ;;  %199 = vmatmul.msk.f32.vlgmr.msra.gmra.mxu0 %vm87_vm1, %v68_v24 }
  0x29   :  { %228 = vmatpush.msra.mxu3 %v124_v26  ;;  %163 = vmatpush.msra.mxu1 %v124_v26 }
  0x2b   :  { %229 = vmatpush.msra.mxu3 %v123_v27  ;;  %164 = vmatpush.msra.mxu1 %v123_v27 }
  0xa5   :  { %v115_v29 = vpop.f32.mrf.mxu0 }
  0xa6   :  { %v116_v30 = vadd.f32 %v236_v28, %v115_v29 }
  0xa8   :  { %v121_v31 = vmax.f32 %v116_v30, 0.0 }
  0xaa   :  { %202 = vmatmul.msk.f32.vlgmr.msra.gmra.mxu1 %vm87_vm1, %v121_v31 }
  0xab   :  { %v118_v32 = vpop.f32.mrf.mxu2 }
  0xac   :  { %v119_v33 = vadd.f32 %v236_v28, %v118_v32 }
  0xae   :  { %v122_v34 = vmax.f32 %v119_v33, 0.0 }
  0xb0   :  { %203 = vmatmul.msk.f32.vlgmr.msra.gmra.mxu3 %vm87_vm1, %v122_v34 }
 0x127   :  { %v166_v36 = vpop.f32.mrf.mxu1 }
 0x128   :  { %v167_v37 = vadd.f32 %v237_v35, %v166_v36 }
 0x12a   :  { %v172_v38 = vmax.f32 %v167_v37, 0.0 }
 0x12c   :  { %v174_v39 = vadd.f32 %v172_v38, %v68_v24 }
 0x12e   :  { %176 = vst.msk [vmem:[#allocation8] sm:$0xff] %vm87_vm1, %v174_v39 }
 0x133   :  { %v169_v40 = vpop.f32.mrf.mxu3 }
 0x134   :  { %v170_v41 = vadd.f32 %v237_v35, %v169_v40 }
 0x136   :  { %v173_v42 = vmax.f32 %v170_v41, 0.0 }
 0x138   :  { %v175_v43 = vadd.f32 %v173_v42, %v69_v23 }
 0x13a   :  { %177 = vst.msk [vmem:[#allocation8 + $0x8] sm:$0xff] %vm87_vm1, %v175_v43 }
 0x13b   :  { %190 = dma.vmem_to_hbm [thread:$0]  %s183_s11, 256, %s185_s14, [#allocation4], %s341_s26, %s341_s26, %s342_s27  }
 0x13c   :  { %338 = dma.done.wait [#allocation4], 256  }
 0x13d   :  { %339 = vsyncadd [#allocation4], 4294967040 }
 0x13e   :  { %195 = vsyncpa [#allocation3], 1 }
 0x13f   :  { %196 = vsyncpa [#allocation6], 1 }
 0x140   :  { %197 = vsyncpa [#allocation4], 1 }

</bundles_post_ra>
